<compile_context>
chip_gen: v6e
topology: v6e:2x2x1
jax: 0.10.0
libtpu: 0.0.40
codegen_flags: <defaults>
</compile_context>

<pallas_src>
import functools

import numpy as np
import jax
import jax.numpy as jnp
from jax.experimental import pallas as pl
from jax.experimental.pallas import tpu as pltpu

HIDDEN = 100   # matches nn.Linear(in_dim, 100) / nn.Linear(100, 100)
LANE = 128
SUBLANE = 8


def _round_up(n, m):
    return ((n + m - 1) // m) * m


def _is_v5e():
    """Best-effort chip detection; only used to pick defaults."""
    try:
        kind = jax.devices()[0].device_kind.lower()
        return ("v5 lite" in kind) or ("v5e" in kind) or ("v5litepod" in kind)
    except Exception:
        return False


def _orthogonal(key, shape, gain):
    """Deterministic orthogonal init (same semantics as torch.nn.init.orthogonal_)."""
    rows, cols = shape
    flat = jax.random.normal(key, (max(rows, cols), min(rows, cols)), dtype=jnp.float32)
    q, r = jnp.linalg.qr(flat)
    sign = jnp.sign(jnp.diagonal(r))
    sign = jnp.where(sign == 0, 1.0, sign)      # guard exact-zero diagonal entries
    q = q * sign[None, :]
    if rows < cols:
        q = q.T
    return (gain * q[:rows, :cols]).astype(jnp.float32)


def init_params(in_dim, out_dim, seed=0):
    """Weights transposed to (fan_in, fan_out) for x @ W; biases are 1-D (zeros)."""
    keys = jax.random.split(jax.random.PRNGKey(seed), 3)
    gain = float(np.sqrt(2.0))
    w1 = _orthogonal(keys[0], (HIDDEN, in_dim), gain).T        # (in_dim, 100)
    w2 = _orthogonal(keys[1], (HIDDEN, HIDDEN), gain).T        # (100, 100)
    w3 = _orthogonal(keys[2], (out_dim, HIDDEN), gain).T       # (100, out_dim)
    b1 = jnp.zeros((HIDDEN,), jnp.float32)
    b2 = jnp.zeros((HIDDEN,), jnp.float32)
    b3 = jnp.zeros((out_dim,), jnp.float32)
    return w1, b1, w2, b2, w3, b3


def prepare_params(params, *, use_bf16=None):
    """One-time weight/bias preparation (hoisted out of the per-call forward).

    Pads only the hidden (100) dims to 128 lanes, fuses the three biases into a
    single (8, 128) f32 operand, and optionally casts weights to bf16 for the MXU.
    """
    if use_bf16 is None:
        use_bf16 = _is_v5e()     # v5e's MXU strongly prefers bf16 inputs
    w1, b1, w2, b2, w3, b3 = params
    in_dim = w1.shape[0]
    out_dim = w3.shape[1]
    hid_pad = _round_up(HIDDEN, LANE)                          # 128
    bias_w = max(hid_pad, _round_up(out_dim, LANE))
    compute_dtype = jnp.bfloat16 if use_bf16 else jnp.float32

    def pad2(a, rows, cols):
        r, c = a.shape
        return jnp.pad(a, ((0, rows - r), (0, cols - c)))

    # in_dim / out_dim stay at natural width so x / out stream at their real size.
    w1p = pad2(w1, in_dim, hid_pad).astype(compute_dtype)      # (in_dim, 128)
    w2p = pad2(w2, hid_pad, hid_pad).astype(compute_dtype)     # (128, 128)
    w3p = pad2(w3, hid_pad, out_dim).astype(compute_dtype)     # (128, out_dim)
    bp = jnp.zeros((SUBLANE, bias_w), jnp.float32)
    bp = bp.at[0, :HIDDEN].set(b1).at[1, :HIDDEN].set(b2).at[2, :out_dim].set(b3)

    cfg = dict(in_dim=in_dim, out_dim=out_dim, hid_pad=hid_pad,
               bias_w=bias_w, use_bf16=bool(use_bf16))
    return (w1p, w2p, w3p, bp, cfg)


def _mlp_kernel(x_ref, w1_ref, w2_ref, w3_ref, b_ref, o_ref, *,
                hid_pad, out_dim, compute_dtype, epilogue_dtype):
    """One batch tile: y = relu(relu(x@W1+b1)@W2+b2)@W3+b3, f32 MXU accumulation."""
    x = x_ref[...].astype(compute_dtype)        # in-kernel cast (VPU filler, no HBM pass)
    b = b_ref[...]                              # (8, bias_w) f32; rows 0..2 = b1,b2,b3
    b1 = b[0:1, :hid_pad].astype(epilogue_dtype)
    b2 = b[1:2, :hid_pad].astype(epilogue_dtype)
    b3 = b[2:3, :out_dim]

    h1 = jnp.dot(x, w1_ref[...], preferred_element_type=jnp.float32)
    h1 = jnp.maximum(h1.astype(epilogue_dtype) + b1, 0.0).astype(compute_dtype)
    h2 = jnp.dot(h1, w2_ref[...], preferred_element_type=jnp.float32)
    h2 = jnp.maximum(h2.astype(epilogue_dtype) + b2, 0.0).astype(compute_dtype)
    o_ref[...] = (jnp.dot(h2, w3_ref[...], preferred_element_type=jnp.float32)
                  + b3).astype(o_ref.dtype)


def zjh_net_forward(x, prepared, *, tile_b=1024, bf16_epilogue=None):
    """Pallas forward pass. x: (B, in_dim) f32. Returns (B, out_dim) f32."""
    w1p, w2p, w3p, bp, cfg = prepared
    B, in_dim = x.shape
    assert in_dim == cfg["in_dim"], "x feature dim does not match prepared params"
    out_dim = cfg["out_dim"]
    hid_pad = cfg["hid_pad"]
    bias_w = cfg["bias_w"]
    use_bf16 = cfg["use_bf16"]
    compute_dtype = jnp.bfloat16 if use_bf16 else jnp.float32
    if bf16_epilogue is None:
        bf16_epilogue = use_bf16 and not _is_v5e()   # v6e/v7x have bf16 VALUs; v5e doesn't
    epilogue_dtype = jnp.bfloat16 if (use_bf16 and bf16_epilogue) else jnp.float32

    # Big batch tile to amortize the ~0.35us/grid-step overhead, clamped so the
    # "parallel" batch axis has >=2 steps when the batch allows (v7x: 2 TCs).
    tb = min(tile_b, _round_up(max(B, SUBLANE), SUBLANE))
    if B > SUBLANE and tb >= B:
        tb = _round_up(pl.cdiv(B, 2), SUBLANE)
    tb = max(SUBLANE, _round_up(tb, SUBLANE))
    grid = (pl.cdiv(B, tb),)          # ragged final block: OOB rows masked on store

    kernel = functools.partial(_mlp_kernel, hid_pad=hid_pad, out_dim=out_dim,
                               compute_dtype=compute_dtype,
                               epilogue_dtype=epilogue_dtype)

    return pl.pallas_call(
        kernel,
        out_shape=jax.ShapeDtypeStruct((B, out_dim), jnp.float32),
        grid=grid,
        in_specs=[
            pl.BlockSpec((tb, in_dim), lambda i: (i, 0)),       # streamed activations (natural width)
            pl.BlockSpec((in_dim, hid_pad), lambda i: (0, 0)),  # resident weights
            pl.BlockSpec((hid_pad, hid_pad), lambda i: (0, 0)),
            pl.BlockSpec((hid_pad, out_dim), lambda i: (0, 0)),
            pl.BlockSpec((SUBLANE, bias_w), lambda i: (0, 0)),  # fused biases
        ],
        out_specs=pl.BlockSpec((tb, out_dim), lambda i: (i, 0)),  # natural out width
        compiler_params=pltpu.CompilerParams(
            dimension_semantics=("parallel",),   # batch tiles independent -> 2 TCs on v7x
        ),
    )(x, w1p, w2p, w3p, bp)


def zjh_net_reference(x, params):
    w1, b1, w2, b2, w3, b3 = params
    h1 = jnp.maximum(x @ w1 + b1, 0.0)
    h2 = jnp.maximum(h1 @ w2 + b2, 0.0)
    return h2 @ w3 + b3


if __name__ == "__main__":
    in_dim, out_dim = 16, 4
    params = init_params(in_dim, out_dim, seed=0)
    prep_f32 = prepare_params(params, use_bf16=False)
    prep_bf16 = prepare_params(params, use_bf16=True)

    # 1) Small batch (PPO-style single step), exact f32 path, single grid step.
    x_small = jax.random.normal(jax.random.PRNGKey(0), (8, in_dim), dtype=jnp.float32)
    out_small = jax.block_until_ready(zjh_net_forward(x_small, prep_f32))
    np.testing.assert_allclose(np.asarray(out_small),
                               np.asarray(zjh_net_reference(x_small, params)),
                               rtol=1e-5, atol=1e-5)

    # 2) Larger batch (2 grid steps via the >=2-step clamp), f32 and bf16 paths.
    x_big = jax.random.normal(jax.random.PRNGKey(1), (512, in_dim), dtype=jnp.float32)
    ref_big = zjh_net_reference(x_big, params)
    out_f32 = jax.block_until_ready(zjh_net_forward(x_big, prep_f32))
    np.testing.assert_allclose(np.asarray(out_f32), np.asarray(ref_big),
                               rtol=1e-5, atol=1e-5)
    out_bf16 = jax.block_until_ready(zjh_net_forward(x_big, prep_bf16))
    np.testing.assert_allclose(np.asarray(out_bf16), np.asarray(ref_big),
                               rtol=3e-2, atol=3e-2)

    # 3) Ragged batch (B not a multiple of the tile): exercises masked last block.
    x_rag = jax.random.normal(jax.random.PRNGKey(2), (200, in_dim), dtype=jnp.float32)
    out_rag = jax.block_until_ready(zjh_net_forward(x_rag, prep_f32))
    np.testing.assert_allclose(np.asarray(out_rag),
                               np.asarray(zjh_net_reference(x_rag, params)),
                               rtol=1e-5, atol=1e-5)

    # 4) Non-zero biases (not the module's init, just validates bias plumbing).
    keyb = jax.random.split(jax.random.PRNGKey(3), 3)
    params_b = (params[0], 0.1 * jax.random.normal(keyb[0], (HIDDEN,)),
                params[2], 0.1 * jax.random.normal(keyb[1], (HIDDEN,)),
                params[4], 0.1 * jax.random.normal(keyb[2], (out_dim,)))
    prep_b = prepare_params(params_b, use_bf16=False)
    out_b = jax.block_until_ready(zjh_net_forward(x_small, prep_b))
    np.testing.assert_allclose(np.asarray(out_b),
                               np.asarray(zjh_net_reference(x_small, params_b)),
                               rtol=1e-5, atol=1e-5)

    print("KERNEL_OK")
</pallas_src>

<mosaic_0001>
module attributes {stable_mosaic.version = 11 : i64} {
  func.func @_mlp_kernel(%arg0: i32, %arg1: memref<8x16xf32, #tpu.memory_space<vmem>>, %arg2: memref<16x128xf32, #tpu.memory_space<vmem>>, %arg3: memref<128x128xf32, #tpu.memory_space<vmem>>, %arg4: memref<128x4xf32, #tpu.memory_space<vmem>>, %arg5: memref<8x128xf32, #tpu.memory_space<vmem>>, %arg6: memref<8x4xf32, #tpu.memory_space<vmem>>) attributes {dimension_semantics = [#tpu.dimension_semantics<parallel>], iteration_bounds = array<i64: 1>, scalar_prefetch = 0 : i64, scratch_operands = 0 : i64, tpu.core_type = #tpu.core_type<tc>, window_params = [{transform_indices = @transform_0, window_bounds = array<i64: 8, 16>}, {pipeline_mode = #tpu.pipeline_mode<synchronous>, transform_indices = @transform_1, window_bounds = array<i64: 16, 128>}, {pipeline_mode = #tpu.pipeline_mode<synchronous>, transform_indices = @transform_2, window_bounds = array<i64: 128, 128>}, {pipeline_mode = #tpu.pipeline_mode<synchronous>, transform_indices = @transform_3, window_bounds = array<i64: 128, 4>}, {pipeline_mode = #tpu.pipeline_mode<synchronous>, transform_indices = @transform_4, window_bounds = array<i64: 8, 128>}, {transform_indices = @transform_5, window_bounds = array<i64: 8, 4>}]} {
    %c0 = arith.constant 0 : index
    %c0_0 = arith.constant 0 : index
    %0 = vector.load %arg1[%c0, %c0_0] : memref<8x16xf32, #tpu.memory_space<vmem>>, vector<8x16xf32>
    %c0_1 = arith.constant 0 : index
    %c0_2 = arith.constant 0 : index
    %1 = vector.load %arg5[%c0_1, %c0_2] : memref<8x128xf32, #tpu.memory_space<vmem>>, vector<8x128xf32>
    %2 = vector.extract_strided_slice %1 {offsets = [0, 0], sizes = [1, 128], strides = [1, 1]} : vector<8x128xf32> to vector<1x128xf32>
    %3 = vector.extract_strided_slice %1 {offsets = [1, 0], sizes = [1, 128], strides = [1, 1]} : vector<8x128xf32> to vector<1x128xf32>
    %4 = vector.extract_strided_slice %1 {offsets = [2, 0], sizes = [1, 4], strides = [1, 1]} : vector<8x128xf32> to vector<1x4xf32>
    %c0_3 = arith.constant 0 : index
    %c0_4 = arith.constant 0 : index
    %5 = vector.load %arg2[%c0_3, %c0_4] : memref<16x128xf32, #tpu.memory_space<vmem>>, vector<16x128xf32>
    %cst = arith.constant dense<0.000000e+00> : vector<8x128xf32>
    %6 = tpu.matmul %0, %5, %cst {dimension_numbers = #tpu.dot_dimension_numbers<[1], [0], [0], [1], [0, 0, 1, 1], [], []>} : vector<8x16xf32>, vector<16x128xf32>, vector<8x128xf32> -> vector<8x128xf32>
    %7 = vector.broadcast %2 : vector<1x128xf32> to vector<8x128xf32>
    %8 = arith.addf %6, %7 : vector<8x128xf32>
    %cst_5 = arith.constant 0.000000e+00 : f32
    %9 = vector.broadcast %cst_5 : f32 to vector<8x128xf32>
    %10 = arith.maximumf %8, %9 : vector<8x128xf32>
    %c0_6 = arith.constant 0 : index
    %c0_7 = arith.constant 0 : index
    %11 = vector.load %arg3[%c0_6, %c0_7] : memref<128x128xf32, #tpu.memory_space<vmem>>, vector<128x128xf32>
    %cst_8 = arith.constant dense<0.000000e+00> : vector<8x128xf32>
    %12 = tpu.matmul %10, %11, %cst_8 {dimension_numbers = #tpu.dot_dimension_numbers<[1], [0], [0], [1], [0, 0, 1, 1], [], []>} : vector<8x128xf32>, vector<128x128xf32>, vector<8x128xf32> -> vector<8x128xf32>
    %13 = vector.broadcast %3 : vector<1x128xf32> to vector<8x128xf32>
    %14 = arith.addf %12, %13 : vector<8x128xf32>
    %cst_9 = arith.constant 0.000000e+00 : f32
    %15 = vector.broadcast %cst_9 : f32 to vector<8x128xf32>
    %16 = arith.maximumf %14, %15 : vector<8x128xf32>
    %c0_10 = arith.constant 0 : index
    %c0_11 = arith.constant 0 : index
    %17 = vector.load %arg4[%c0_10, %c0_11] : memref<128x4xf32, #tpu.memory_space<vmem>>, vector<128x4xf32>
    %cst_12 = arith.constant dense<0.000000e+00> : vector<8x4xf32>
    %18 = tpu.matmul %16, %17, %cst_12 {dimension_numbers = #tpu.dot_dimension_numbers<[1], [0], [0], [1], [0, 0, 1, 1], [], []>} : vector<8x128xf32>, vector<128x4xf32>, vector<8x4xf32> -> vector<8x4xf32>
    %19 = vector.broadcast %4 : vector<1x4xf32> to vector<8x4xf32>
    %20 = arith.addf %18, %19 : vector<8x4xf32>
    %c0_13 = arith.constant 0 : index
    %c0_14 = arith.constant 0 : index
    %21 = vector.load %arg6[%c0_13, %c0_14] : memref<8x4xf32, #tpu.memory_space<vmem>>, vector<8x4xf32>
    tpu.vector_store %arg6[%c0_13, %c0_14], %20 {strides = array<i32>} : memref<8x4xf32, #tpu.memory_space<vmem>>, vector<8x4xf32>,
    return
  }
  func.func @transform_0(%arg0: i32) -> (i32, i32) {
    %c0_i32 = arith.constant 0 : i32
    %c0_i32_0 = arith.constant 0 : i32
    return %arg0, %c0_i32 : i32, i32
  }
  func.func @transform_1(%arg0: i32) -> (i32, i32) {
    %c0_i32 = arith.constant 0 : i32
    %c0_i32_0 = arith.constant 0 : i32
    %c0_i32_1 = arith.constant 0 : i32
    return %c0_i32, %c0_i32_0 : i32, i32
  }
  func.func @transform_2(%arg0: i32) -> (i32, i32) {
    %c0_i32 = arith.constant 0 : i32
    %c0_i32_0 = arith.constant 0 : i32
    %c0_i32_1 = arith.constant 0 : i32
    return %c0_i32, %c0_i32_0 : i32, i32
  }
  func.func @transform_3(%arg0: i32) -> (i32, i32) {
    %c0_i32 = arith.constant 0 : i32
    %c0_i32_0 = arith.constant 0 : i32
    %c0_i32_1 = arith.constant 0 : i32
    return %c0_i32, %c0_i32_0 : i32, i32
  }
  func.func @transform_4(%arg0: i32) -> (i32, i32) {
    %c0_i32 = arith.constant 0 : i32
    %c0_i32_0 = arith.constant 0 : i32
    %c0_i32_1 = arith.constant 0 : i32
    return %c0_i32, %c0_i32_0 : i32, i32
  }
  func.func @transform_5(%arg0: i32) -> (i32, i32) {
    %c0_i32 = arith.constant 0 : i32
    %c0_i32_0 = arith.constant 0 : i32
    return %arg0, %c0_i32 : i32, i32
  }
}

</mosaic_0001>

<bundles_post_ra>
// kernel: tpu_custom_call.1
= control target key start
LH: loop header
LB: loop body
LE: loop exit
PB: predicated region body
PF: predicated region fallthrough
CT: control target
= control target key end

     0   :  { %10 = vsyncpa [#allocation3], 0  ;;  %s667_s0 = inlined_call_operand.hbm [shape: f32[8,16], index: 0, kind: input, shape index: {}]   ;;  %s668_s1 = inlined_call_operand.hbm [shape: f32[16,128], index: 1, kind: input, shape index: {}]   ;;  %s669_s2 = inlined_call_operand.vmem [shape: f32[128,128], index: 2, kind: input, shape index: {}]   ;;  %s670_s3 = inlined_call_operand.vmem [shape: f32[128,4], index: 3, kind: input, shape index: {}]   ;;  %s671_s4 = inlined_call_operand.vmem [shape: f32[8,128], index: 4, kind: input, shape index: {}]   ;;  %s672_s5 = inlined_call_operand.vmem [shape: f32[8,4], index: 5, kind: output, shape index: {}]  }
   0x1   :  { %11 = vsyncpa [#allocation5], 0  ;;  %s483_s18 = smov [#allocation2]   ;;  %s484_s20 = smov [#allocation4]  }
   0x2   :  { %s18_s19 = sshll.u32 %s483_s18, 4  ;;  %s27_s21 = sshll.u32 %s484_s20, 4  ;;  %s19_s19 = int_to_ptr.vmem [resolvable:$true] %s18_s19  ;;  %s28_s21 = int_to_ptr.vmem [resolvable:$true] %s27_s21 }
   0x3   :  { %s447_s22 = scalar_lea.vmem %s19_s19, 128  ;;  %p452_p1 = scmp.lt.s32.totalorder %s19_s19, %s19_s19 }
   0x4   :  { %p448_p0 = scmp.ne.s32.totalorder %s19_s19, %s447_s22  ;;  %p453_p2 = scmp.lt.s32.totalorder %s447_s22, %s447_s22 }
   0x6   :  { %p454_p3 = por %p453_p2, %p452_p1 }
   0x8   :  { %p455_p4 = pnand %p454_p3, %p448_p0 }
   0xa   :  { %458 = shalt.err (!%p455_p4)
}
   0xb   :  { %21 = dma.hbm_to_vmem [thread:$0]  %s667_s0, 128, %s19_s19, [#allocation3]  }
   0xc   :  { %s467_s25 = scalar_lea.vmem %s28_s21, 256  ;;  %p472_p6 = scmp.lt.s32.totalorder %s28_s21, %s28_s21 }
   0xd   :  { %p468_p5 = scmp.ne.s32.totalorder %s28_s21, %s467_s25  ;;  %p473_p7 = scmp.lt.s32.totalorder %s467_s25, %s467_s25 }
   0xf   :  { %p474_p8 = por %p473_p7, %p472_p6 }
  0x11   :  { %p475_p9 = pnand %p474_p8, %p468_p5 }
  0x13   :  { %478 = shalt.err (!%p475_p9)
}
  0x14   :  { %s485_s26 = smov 128   ;;  %s486_s27 = smov 8  }
  0x15   :  { %33 = dma.hbm_to_vmem [thread:$0]  %s668_s1, 256, %s28_s21, [#allocation5], %s485_s26, %s485_s26, %s486_s27  }
  0x16   :  { %479 = dma.done.wait [#allocation3], 128  }
  0x17   :  { %480 = vsyncadd [#allocation3], 4294967168 }
  0x18   :  { %481 = dma.done.wait [#allocation5], 256  }
  0x19   :  { %482 = vsyncadd [#allocation5], 4294967040  ;;  %v487_v0 = vmov 0.0   ;;  %vm488_vm0 = vmmov 0   ;;  %v49_v1 = vld [vmem:[#allocation4 + $0x8] sm:$0xff]  ;;  %v48_v2 = vld [vmem:[#allocation4] sm:$0xff]  ;;  %v50_v33 = vlaneseq }
  0x1a   :  { %356 = vmatprep.subr.mxu0 %v487_v0  ;;  %360 = vmatprep.mubr.msk.f32.mxu0 %vm488_vm0, %v487_v0  ;;  %v46_v3 = vld [vmem:[#allocation2] sm:$0xff]  ;;  %vm54_vm1 = vcmask 130048   ;;  %v144_v4 = vld [vmem:[%s669_s2 + $0x78] sm:$0xff]  ;;  %v143_v5 = vld [vmem:[%s669_s2 + $0x70] sm:$0xff]  ;;  %vm310_vm2 = vcmask 31744  }
  0x1b   :  { %363 = vmatprep.subr.mxu1 %v487_v0  ;;  %395 = vmatprep.mubr.msk.f32.mxu1 %vm488_vm0, %v487_v0  ;;  %v142_v6 = vld [vmem:[%s669_s2 + $0x68] sm:$0xff]  ;;  %v141_v7 = vld [vmem:[%s669_s2 + $0x60] sm:$0xff]  ;;  %v140_v8 = vld [vmem:[%s669_s2 + $0x58] sm:$0xff]  ;;  %v51_v34 = vshrl.u32 %v50_v33, 7 }
  0x1c   :  { %357 = vmatpush3.msra.mxu0 %v49_v1  ;;  %364 = vmatpush3.msra.mxu1 %v144_v4  ;;  %v139_v9 = vld [vmem:[%s669_s2 + $0x50] sm:$0xff]  ;;  %v138_v10 = vld [vmem:[%s669_s2 + $0x48] sm:$0xff]  ;;  %v137_v11 = vld [vmem:[%s669_s2 + $0x40] sm:$0xff] }
  0x1d   :  { %358 = vmatprep.subr.mxu0 %v487_v0  ;;  %365 = vmatprep.subr.mxu1 %v487_v0  ;;  %v136_v12 = vld [vmem:[%s669_s2 + $0x38] sm:$0xff]  ;;  %v135_v13 = vld [vmem:[%s669_s2 + $0x30] sm:$0xff]  ;;  %v134_v14 = vld [vmem:[%s669_s2 + $0x28] sm:$0xff]  ;;  %v52_v35 = vsub.s32 0, %v51_v34  ;;  %v147_v45 = vsub.s32 1, %v51_v34  ;;  %v238_v51 = vsub.s32 2, %v51_v34 }
  0x1e   :  { %359 = vmatpush3.msra.mxu0 %v48_v2  ;;  %366 = vmatpush3.msra.mxu1 %v143_v5  ;;  %v133_v15 = vld [vmem:[%s669_s2 + $0x20] sm:$0xff]  ;;  %v132_v16 = vld [vmem:[%s669_s2 + $0x18] sm:$0xff]  ;;  %v131_v17 = vld [vmem:[%s669_s2 + $0x10] sm:$0xff] }
  0x1f   :  { %361 = vmatmul.mubr.msk.f32.vlgmr.msra.gmra.mxu0 %vm54_vm1, %v46_v3  ;;  %367 = vmatprep.subr.mxu1 %v487_v0  ;;  %v130_v18 = vld [vmem:[%s669_s2 + $0x8] sm:$0xff]  ;;  %v129_v19 = vld [vmem:[%s669_s2] sm:$0xff]  ;;  %v235_v20 = vld [vmem:[%s670_s3 + $0x78] sm:$0xff] }
  0x20   :  { %398 = vmatprep.subr.mxu0 %v487_v0  ;;  %368 = vmatpush3.msra.mxu1 %v142_v6  ;;  %v234_v21 = vld [vmem:[%s670_s3 + $0x70] sm:$0xff]  ;;  %v233_v22 = vld [vmem:[%s670_s3 + $0x68] sm:$0xff]  ;;  %v232_v23 = vld [vmem:[%s670_s3 + $0x60] sm:$0xff] }
  0x21   :  { %430 = vmatprep.mubr.msk.f32.mxu0 %vm488_vm0, %v487_v0  ;;  %369 = vmatprep.subr.mxu1 %v487_v0  ;;  %v231_v24 = vld [vmem:[%s670_s3 + $0x58] sm:$0xff]  ;;  %v230_v25 = vld [vmem:[%s670_s3 + $0x50] sm:$0xff]  ;;  %v229_v26 = vld [vmem:[%s670_s3 + $0x48] sm:$0xff] }
  0x22   :  { %370 = vmatpush3.msra.mxu1 %v141_v7  ;;  %399 = vmatpush3.msra.mxu0 %v235_v20  ;;  %v228_v27 = vld [vmem:[%s670_s3 + $0x40] sm:$0xff]  ;;  %v227_v28 = vld [vmem:[%s670_s3 + $0x38] sm:$0xff]  ;;  %v226_v29 = vld [vmem:[%s670_s3 + $0x30] sm:$0xff] }
  0x23   :  { %371 = vmatprep.subr.mxu1 %v487_v0  ;;  %400 = vmatprep.subr.mxu0 %v487_v0  ;;  %v225_v30 = vld [vmem:[%s670_s3 + $0x28] sm:$0xff]  ;;  %v224_v31 = vld [vmem:[%s670_s3 + $0x20] sm:$0xff]  ;;  %v223_v32 = vld [vmem:[%s670_s3 + $0x18] sm:$0xff] }
  0x24   :  { %372 = vmatpush3.msra.mxu1 %v140_v8  ;;  %401 = vmatpush3.msra.mxu0 %v234_v21  ;;  %v47_v36 = vld [vmem:[%s671_s4] sm:$0xff]  ;;  %v222_v42 = vld [vmem:[%s670_s3 + $0x10] sm:$0xff]  ;;  %v221_v43 = vld [vmem:[%s670_s3 + $0x8] sm:$0xff] }
  0x25   :  { %373 = vmatprep.subr.mxu1 %v487_v0  ;;  %402 = vmatprep.subr.mxu0 %v487_v0  ;;  %v53_v37 = vrot.slane %v47_v36, %v52_v35  ;;  %v220_v44 = vld [vmem:[%s670_s3] sm:$0xff]  ;;  %v148_v46 = vrot.slane %v47_v36, %v147_v45  ;;  %v239_v52 = vrot.slane %v47_v36, %v238_v51 }
  0x26   :  { %374 = vmatpush3.msra.mxu1 %v139_v9  ;;  %403 = vmatpush3.msra.mxu0 %v233_v22 }
  0x27   :  { %375 = vmatprep.subr.mxu1 %v487_v0  ;;  %404 = vmatprep.subr.mxu0 %v487_v0 }
  0x28   :  { %376 = vmatpush3.msra.mxu1 %v138_v10  ;;  %405 = vmatpush3.msra.mxu0 %v232_v23 }
  0x29   :  { %377 = vmatprep.subr.mxu1 %v487_v0  ;;  %406 = vmatprep.subr.mxu0 %v487_v0 }
  0x2a   :  { %378 = vmatpush3.msra.mxu1 %v137_v11  ;;  %407 = vmatpush3.msra.mxu0 %v231_v24 }
  0x2b   :  { %379 = vmatprep.subr.mxu1 %v487_v0  ;;  %408 = vmatprep.subr.mxu0 %v487_v0 }
  0x2c   :  { %380 = vmatpush3.msra.mxu1 %v136_v12  ;;  %409 = vmatpush3.msra.mxu0 %v230_v25 }
  0x2d   :  { %381 = vmatprep.subr.mxu1 %v487_v0  ;;  %410 = vmatprep.subr.mxu0 %v487_v0 }
  0x2e   :  { %382 = vmatpush3.msra.mxu1 %v135_v13  ;;  %411 = vmatpush3.msra.mxu0 %v229_v26 }
  0x2f   :  { %383 = vmatprep.subr.mxu1 %v487_v0  ;;  %412 = vmatprep.subr.mxu0 %v487_v0 }
  0x30   :  { %384 = vmatpush3.msra.mxu1 %v134_v14  ;;  %413 = vmatpush3.msra.mxu0 %v228_v27 }
  0x31   :  { %385 = vmatprep.subr.mxu1 %v487_v0  ;;  %414 = vmatprep.subr.mxu0 %v487_v0 }
  0x32   :  { %386 = vmatpush3.msra.mxu1 %v133_v15  ;;  %415 = vmatpush3.msra.mxu0 %v227_v28 }
  0x33   :  { %387 = vmatprep.subr.mxu1 %v487_v0  ;;  %416 = vmatprep.subr.mxu0 %v487_v0 }
  0x34   :  { %388 = vmatpush3.msra.mxu1 %v132_v16  ;;  %417 = vmatpush3.msra.mxu0 %v226_v29 }
  0x35   :  { %389 = vmatprep.subr.mxu1 %v487_v0  ;;  %418 = vmatprep.subr.mxu0 %v487_v0 }
  0x36   :  { %390 = vmatpush3.msra.mxu1 %v131_v17  ;;  %419 = vmatpush3.msra.mxu0 %v225_v30 }
  0x37   :  { %391 = vmatprep.subr.mxu1 %v487_v0  ;;  %420 = vmatprep.subr.mxu0 %v487_v0 }
  0x38   :  { %392 = vmatpush3.msra.mxu1 %v130_v18  ;;  %421 = vmatpush3.msra.mxu0 %v224_v31 }
  0x39   :  { %393 = vmatprep.subr.mxu1 %v487_v0  ;;  %422 = vmatprep.subr.mxu0 %v487_v0 }
  0x3a   :  { %394 = vmatpush3.msra.mxu1 %v129_v19  ;;  %423 = vmatpush3.msra.mxu0 %v223_v32 }
  0x3b   :  { %424 = vmatprep.subr.mxu0 %v487_v0 }
  0x3c   :  { %425 = vmatpush3.msra.mxu0 %v222_v42 }
  0x3d   :  { %426 = vmatprep.subr.mxu0 %v487_v0 }
  0x3e   :  { %427 = vmatpush3.msra.mxu0 %v221_v43 }
  0x3f   :  { %428 = vmatprep.subr.mxu0 %v487_v0 }
  0x40   :  { %429 = vmatpush3.msra.mxu0 %v220_v44 }
  0xdf   :  { %v124_v38 = vpop.f32.mrf.mxu0 }
  0xe0   :  { %v125_v39 = vadd.f32 %v124_v38, %v53_v37 }
  0xe1   :  { %v362_v40 = vpop.f32.mrf.mxu0 }
  0xe2   :  { %v128_v41 = vmax.f32 %v125_v39, 0.0 }
  0xe4   :  { %396 = vmatmul.mubr.f32.vlgmr.msra.gmra.mxu1 %v128_v41 }
 0x1a4   :  { %v215_v47 = vpop.f32.mrf.mxu1 }
 0x1a5   :  { %v216_v48 = vadd.f32 %v215_v47, %v148_v46 }
 0x1a6   :  { %v397_v49 = vpop.f32.mrf.mxu1 }
 0x1a7   :  { %v219_v50 = vmax.f32 %v216_v48, 0.0 }
 0x1a9   :  { %431 = vmatmul.mubr.f32.vlgmr.msra.gmra.mxu0 %v219_v50 }
 0x269   :  { %v306_v53 = vpop.f32.mrf.mxu0 }
 0x26a   :  { %v307_v54 = vadd.f32 %v306_v53, %v239_v52 }
 0x26b   :  { %v432_v55 = vpop.f32.mrf.mxu0 }
 0x26c   :  { %311 = vst.msk [vmem:[%s672_s5] sm:$0xff] %vm310_vm2, %v307_v54 }
 0x26d   :  { %316 = vsyncpa [#allocation3], 1 }
 0x26e   :  { %317 = vsyncpa [#allocation5], 1 }

</bundles_post_ra>
